<compile_context>
chip_gen: v5e
topology: v5e:2x2
jax: 0.10.0
libtpu: 0.0.40
codegen_flags: <defaults>
</compile_context>

<pallas_src>
import functools
import math

import jax
import jax.numpy as jnp
from jax import lax
from jax.experimental import pallas as pl
from jax.experimental.pallas import tpu as pltpu


_EPS = 1e-8  # torch.nn.CosineSimilarity default eps


def _debias_ntxent_kernel(pos_ref, q_ref, kt_ref, o_ref, *, temperature, rho,
                          n_total):
    """One row-block: per-row debiased NT-Xent loss against all N keys.

    pos_ref : (tm, 1)  f32   cos(query row, its positive partner)
    q_ref   : (tm, Dp) bf16  L2-normalized query rows, pre-scaled by 1/T
    kt_ref  : (Dp, N)  bf16  L2-normalized keys, pre-transposed (grid-invariant)
    o_ref   : (tm, 1)  f32   per-row loss
    """
    inv_t = 1.0 / float(temperature)
    n_neg = float(n_total - 2)
    inv_one_minus_rho = 1.0 / (1.0 - float(rho))
    clamp_min = n_neg * math.exp(-inv_t)
    # Rows are unit-norm, so the self-similarity is exactly exp(1/T).
    self_sim = math.exp(inv_t)

    # (tm, N) slab of cos/T via one NN MXU contraction (queries carry the 1/T
    # factor), then the N^2 exp() + lane-reduce.  This is the hot loop.
    # TODO(synk): on v6e/v7x the exp could run on a bf16 slab (packed EUP) if
    #             profiling shows the EUP slot is binding; kept f32 for parity.
    slab = jnp.dot(q_ref[...], kt_ref[...], preferred_element_type=jnp.float32)
    row_sum = jnp.sum(jnp.exp(slab), axis=-1, keepdims=True)            # (tm, 1)

    pos = jnp.exp(pos_ref[...] * inv_t)                                 # (tm, 1)
    neg_sum = row_sum - self_sim - pos
    ng = (-rho * n_neg * pos + neg_sum) * inv_one_minus_rho
    ng = jnp.maximum(ng, clamp_min)                                     # clamp(min=...)
    o_ref[...] = -jnp.log(pos / (pos + ng))


def _vmem_capacity_bytes():
    try:
        cap = getattr(pltpu.get_tpu_info(), "vmem_capacity_bytes", None)
        if cap:
            return int(cap)
    except Exception:
        pass
    return 64 * 1024 * 1024  # conservative: v7x per-TensorCore VMEM


def _vmem_estimate(tm, n_rows, d_pad, itemsize, key_buffers=1):
    keys = d_pad * n_rows * itemsize * key_buffers   # resident keys^T
    qblk = 2 * tm * d_pad * itemsize                 # query block, double-buffered
    small = 2 * 2 * (tm * 4)                         # pos-cos in + per-row out blocks
    slab = 3 * tm * n_rows * 4                       # cos/T slab + exp temporaries (f32)
    return keys + qblk + small + slab


def _pick_row_block(n_rows, d_pad, itemsize):
    budget = int(0.4 * _vmem_capacity_bytes())
    divisors = [c for c in (1024, 512, 256, 128, 64, 32, 16, 8) if n_rows % c == 0]
    for cand in divisors:                            # largest first
        if _vmem_estimate(cand, n_rows, d_pad, itemsize) <= budget:
            return cand
    if divisors:
        return divisors[-1]                          # smallest 8-aligned divisor
    return n_rows                                    # odd/tiny N: one full-extent block


def debias_ntxent_loss(z_i, z_j, *, temperature, rho, row_block=None,
                       mxu_dtype=jnp.bfloat16):
    """Pallas TPU implementation of DebiasNtXentLoss.forward(z_i, z_j)."""
    assert z_i.shape == z_j.shape and z_i.ndim == 2
    B, D = z_i.shape
    N = 2 * B
    inv_t = 1.0 / float(temperature)

    # ---- O(N*D) preprocessing: once, outside the grid loop (fused XLA ops) ----
    z = jnp.concatenate([z_i, z_j], axis=0).astype(jnp.float32)          # (N, D)
    sq = jnp.sum(z * z, axis=-1, keepdims=True)
    # 1/max(||z||, eps): matches torch CosineSimilarity except rows with norm<eps.
    zn = z * lax.rsqrt(jnp.maximum(sq, _EPS * _EPS))                     # unit rows
    # Positive partner of row r is row (r + B) mod N.
    pos_cos = jnp.sum(zn * jnp.roll(zn, B, axis=0), axis=-1, keepdims=True)

    # Pad the feature dim to a lane multiple (zero columns change no dot).
    Dp = ((D + 127) // 128) * 128
    zn_p = zn if Dp == D else jnp.pad(zn, ((0, 0), (0, Dp - D)))
    q = (zn_p * inv_t).astype(mxu_dtype)       # (N, Dp): 1/T folded into queries
    kt = zn_p.T.astype(mxu_dtype)              # (Dp, N): keys pre-transposed, resident

    itemsize = jnp.dtype(mxu_dtype).itemsize
    if row_block is None:
        row_block = _pick_row_block(N, Dp, itemsize)
    assert N % row_block == 0, (N, row_block)
    num_blocks = N // row_block

    est = _vmem_estimate(row_block, N, Dp, itemsize)
    vmem_limit = int(min(_vmem_capacity_bytes(), max(2 * est, 8 * 1024 * 1024)))

    kernel = functools.partial(
        _debias_ntxent_kernel,
        temperature=float(temperature),
        rho=float(rho),
        n_total=N,
    )

    # TODO(synk): for very large N*Dp where even single-buffered keys overflow
    #             VMEM, add a key-block reduction grid axis (row_sum scratch).
    def _run(single_buffer_keys):
        key_kwargs = {"pipeline_mode": pl.Buffered(1)} if single_buffer_keys else {}
        return pl.pallas_call(
            kernel,
            out_shape=jax.ShapeDtypeStruct((N, 1), jnp.float32),
            grid=(num_blocks,),
            in_specs=[
                pl.BlockSpec((row_block, 1), lambda i: (i, 0)),           # pos_cos
                pl.BlockSpec((row_block, Dp), lambda i: (i, 0)),          # queries
                pl.BlockSpec((Dp, N), lambda i: (0, 0), **key_kwargs),    # keys^T
            ],
            out_specs=pl.BlockSpec((row_block, 1), lambda i: (i, 0)),
            compiler_params=pltpu.CompilerParams(
                # Row blocks are independent -> megacore-shardable on v7x.
                dimension_semantics=("parallel",),
                vmem_limit_bytes=vmem_limit,
            ),
        )(pos_cos, q, kt)

    try:
        per_row = _run(single_buffer_keys=True)
        jax.block_until_ready(per_row)   # surface any deferred lowering error here
    except Exception:
        # pl.Buffered(1) single-buffering of the resident keys is a perf-only
        # hint; fall back to default double-buffering if this build rejects it.
        per_row = _run(single_buffer_keys=False)

    return jnp.mean(per_row)


def _reference_loss(z_i, z_j, *, temperature, rho):
    # Pure-JAX f32 mirror of the PyTorch forward (divide-form cosine similarity).
    B = z_i.shape[0]
    N = 2 * B
    z = jnp.concatenate([z_i, z_j], axis=0).astype(jnp.float32)
    norms = jnp.sqrt(jnp.sum(z * z, axis=-1, keepdims=True))
    cos = (z @ z.T) / jnp.maximum(norms * norms.T, _EPS)
    sim = jnp.exp(cos / temperature)
    idx = jnp.arange(N)
    pos = sim[idx, (idx + B) % N][:, None]
    self_sim = sim[idx, idx][:, None]
    neg_sum = jnp.sum(sim, axis=-1, keepdims=True) - self_sim - pos
    n_neg = float(N - 2)
    ng = (-rho * n_neg * pos + neg_sum) / (1.0 - rho)
    ng = jnp.maximum(ng, n_neg * math.exp(-1.0 / temperature))
    return jnp.mean(-jnp.log(pos / (pos + ng)))


if __name__ == "__main__":
    temperature = 0.5
    rho = 0.1
    B, D = 8, 32  # N = 2*B = 16 rows, feature dim 32

    key = jax.random.PRNGKey(0)
    k1, k2 = jax.random.split(key)
    z_i = jax.random.normal(k1, (B, D), dtype=jnp.float32)
    z_j = jax.random.normal(k2, (B, D), dtype=jnp.float32)

    loss = debias_ntxent_loss(z_i, z_j, temperature=temperature, rho=rho)
    loss = jax.block_until_ready(loss)

    ref = _reference_loss(z_i, z_j, temperature=temperature, rho=rho)
    # bf16 MXU feed -> tolerance-level (not bitwise) parity with the f32 math.
    assert jnp.allclose(loss, ref, rtol=2e-2, atol=1e-3), (loss, ref)

    print("KERNEL_OK")
</pallas_src>

<mosaic_0001>
module attributes {stable_mosaic.version = 11 : i64} {
  func.func @_debias_ntxent_kernel(%arg0: i32, %arg1: memref<16x1xf32, #tpu.memory_space<vmem>>, %arg2: memref<16x128xbf16, #tpu.memory_space<vmem>>, %arg3: memref<128x16xbf16, #tpu.memory_space<vmem>>, %arg4: memref<16x1xf32, #tpu.memory_space<vmem>>) attributes {dimension_semantics = [#tpu.dimension_semantics<parallel>], iteration_bounds = array<i64: 1>, scalar_prefetch = 0 : i64, scratch_operands = 0 : i64, tpu.core_type = #tpu.core_type<tc>, window_params = [{transform_indices = @transform_0, window_bounds = array<i64: 16, 1>}, {transform_indices = @transform_1, window_bounds = array<i64: 16, 128>}, {pipeline_mode = #tpu.pipeline_mode<synchronous>, transform_indices = @transform_2, window_bounds = array<i64: 128, 16>}, {transform_indices = @transform_3, window_bounds = array<i64: 16, 1>}]} {
    %c0 = arith.constant 0 : index
    %c0_0 = arith.constant 0 : index
    %0 = vector.load %arg2[%c0, %c0_0] : memref<16x128xbf16, #tpu.memory_space<vmem>>, vector<16x128xbf16>
    %c0_1 = arith.constant 0 : index
    %c0_2 = arith.constant 0 : index
    %1 = vector.load %arg3[%c0_1, %c0_2] : memref<128x16xbf16, #tpu.memory_space<vmem>>, vector<128x16xbf16>
    %cst = arith.constant dense<0.000000e+00> : vector<16x16xf32>
    %2 = tpu.matmul %0, %1, %cst {dimension_numbers = #tpu.dot_dimension_numbers<[1], [0], [0], [1], [0, 0, 1, 1], [], []>} : vector<16x128xbf16>, vector<128x16xbf16>, vector<16x16xf32> -> vector<16x16xf32>
    %3 = math.exp %2 : vector<16x16xf32>
    %cst_3 = arith.constant dense<0.000000e+00> : vector<16xf32>
    %4 = vector.multi_reduction <add>, %3, %cst_3 [1] : vector<16x16xf32> to vector<16xf32>
    %5 = vector.shape_cast %4 : vector<16xf32> to vector<16x1xf32>
    %c0_4 = arith.constant 0 : index
    %c0_5 = arith.constant 0 : index
    %6 = vector.load %arg1[%c0_4, %c0_5] : memref<16x1xf32, #tpu.memory_space<vmem>>, vector<16x1xf32>
    %cst_6 = arith.constant 2.000000e+00 : f32
    %7 = vector.broadcast %cst_6 : f32 to vector<16x1xf32>
    %8 = arith.mulf %6, %7 : vector<16x1xf32>
    %9 = math.exp %8 : vector<16x1xf32>
    %cst_7 = arith.constant 7.3890562 : f32
    %10 = vector.broadcast %cst_7 : f32 to vector<16x1xf32>
    %11 = arith.subf %5, %10 : vector<16x1xf32>
    %12 = arith.subf %11, %9 : vector<16x1xf32>
    %cst_8 = arith.constant -1.400000e+00 : f32
    %13 = vector.broadcast %cst_8 : f32 to vector<16x1xf32>
    %14 = arith.mulf %13, %9 : vector<16x1xf32>
    %15 = arith.addf %14, %12 : vector<16x1xf32>
    %cst_9 = arith.constant 1.11111116 : f32
    %16 = vector.broadcast %cst_9 : f32 to vector<16x1xf32>
    %17 = arith.mulf %15, %16 : vector<16x1xf32>
    %cst_10 = arith.constant 1.89469397 : f32
    %18 = vector.broadcast %cst_10 : f32 to vector<16x1xf32>
    %19 = arith.maximumf %17, %18 : vector<16x1xf32>
    %20 = arith.addf %9, %19 : vector<16x1xf32>
    %21 = arith.divf %9, %20 : vector<16x1xf32>
    %22 = math.log %21 : vector<16x1xf32>
    %cst_11 = arith.constant 0.000000e+00 : f32
    %23 = vector.broadcast %cst_11 : f32 to vector<16x1xf32>
    %24 = arith.subf %23, %22 : vector<16x1xf32>
    %c0_12 = arith.constant 0 : index
    %c0_13 = arith.constant 0 : index
    %25 = vector.load %arg4[%c0_12, %c0_13] : memref<16x1xf32, #tpu.memory_space<vmem>>, vector<16x1xf32>
    tpu.vector_store %arg4[%c0_12, %c0_13], %24 {strides = array<i32>} : memref<16x1xf32, #tpu.memory_space<vmem>>, vector<16x1xf32>,
    return
  }
  func.func @transform_0(%arg0: i32) -> (i32, i32) {
    %c0_i32 = arith.constant 0 : i32
    %c0_i32_0 = arith.constant 0 : i32
    return %arg0, %c0_i32 : i32, i32
  }
  func.func @transform_1(%arg0: i32) -> (i32, i32) {
    %c0_i32 = arith.constant 0 : i32
    %c0_i32_0 = arith.constant 0 : i32
    return %arg0, %c0_i32 : i32, i32
  }
  func.func @transform_2(%arg0: i32) -> (i32, i32) {
    %c0_i32 = arith.constant 0 : i32
    %c0_i32_0 = arith.constant 0 : i32
    %c0_i32_1 = arith.constant 0 : i32
    return %c0_i32, %c0_i32_0 : i32, i32
  }
  func.func @transform_3(%arg0: i32) -> (i32, i32) {
    %c0_i32 = arith.constant 0 : i32
    %c0_i32_0 = arith.constant 0 : i32
    return %arg0, %c0_i32 : i32, i32
  }
}

module attributes {stable_mosaic.version = 11 : i64} {
  func.func @_debias_ntxent_kernel(%arg0: i32, %arg1: memref<16x1xf32, #tpu.memory_space<vmem>>, %arg2: memref<16x128xbf16, #tpu.memory_space<vmem>>, %arg3: memref<128x16xbf16, #tpu.memory_space<vmem>>, %arg4: memref<16x1xf32, #tpu.memory_space<vmem>>) attributes {dimension_semantics = [#tpu.dimension_semantics<parallel>], iteration_bounds = array<i64: 1>, scalar_prefetch = 0 : i64, scratch_operands = 0 : i64, tpu.core_type = #tpu.core_type<tc>, window_params = [{transform_indices = @transform_0, window_bounds = array<i64: 16, 1>}, {transform_indices = @transform_1, window_bounds = array<i64: 16, 128>}, {pipeline_mode = #tpu.pipeline_mode<synchronous>, transform_indices = @transform_2, window_bounds = array<i64: 128, 16>}, {transform_indices = @transform_3, window_bounds = array<i64: 16, 1>}]} {
    %c0 = arith.constant 0 : index
    %c0_0 = arith.constant 0 : index
    %0 = vector.load %arg2[%c0, %c0_0] : memref<16x128xbf16, #tpu.memory_space<vmem>>, vector<16x128xbf16>
    %c0_1 = arith.constant 0 : index
    %c0_2 = arith.constant 0 : index
    %1 = vector.load %arg3[%c0_1, %c0_2] : memref<128x16xbf16, #tpu.memory_space<vmem>>, vector<128x16xbf16>
    %cst = arith.constant dense<0.000000e+00> : vector<16x16xf32>
    %2 = tpu.matmul %0, %1, %cst {dimension_numbers = #tpu.dot_dimension_numbers<[1], [0], [0], [1], [0, 0, 1, 1], [], []>} : vector<16x128xbf16>, vector<128x16xbf16>, vector<16x16xf32> -> vector<16x16xf32>
    %3 = math.exp %2 : vector<16x16xf32>
    %cst_3 = arith.constant dense<0.000000e+00> : vector<16xf32>
    %4 = vector.multi_reduction <add>, %3, %cst_3 [1] : vector<16x16xf32> to vector<16xf32>
    %5 = vector.shape_cast %4 : vector<16xf32> to vector<16x1xf32>
    %c0_4 = arith.constant 0 : index
    %c0_5 = arith.constant 0 : index
    %6 = vector.load %arg1[%c0_4, %c0_5] : memref<16x1xf32, #tpu.memory_space<vmem>>, vector<16x1xf32>
    %cst_6 = arith.constant 2.000000e+00 : f32
    %7 = vector.broadcast %cst_6 : f32 to vector<16x1xf32>
    %8 = arith.mulf %6, %7 : vector<16x1xf32>
    %9 = math.exp %8 : vector<16x1xf32>
    %cst_7 = arith.constant 7.3890562 : f32
    %10 = vector.broadcast %cst_7 : f32 to vector<16x1xf32>
    %11 = arith.subf %5, %10 : vector<16x1xf32>
    %12 = arith.subf %11, %9 : vector<16x1xf32>
    %cst_8 = arith.constant -1.400000e+00 : f32
    %13 = vector.broadcast %cst_8 : f32 to vector<16x1xf32>
    %14 = arith.mulf %13, %9 : vector<16x1xf32>
    %15 = arith.addf %14, %12 : vector<16x1xf32>
    %cst_9 = arith.constant 1.11111116 : f32
    %16 = vector.broadcast %cst_9 : f32 to vector<16x1xf32>
    %17 = arith.mulf %15, %16 : vector<16x1xf32>
    %cst_10 = arith.constant 1.89469397 : f32
    %18 = vector.broadcast %cst_10 : f32 to vector<16x1xf32>
    %19 = arith.maximumf %17, %18 : vector<16x1xf32>
    %20 = arith.addf %9, %19 : vector<16x1xf32>
    %21 = arith.divf %9, %20 : vector<16x1xf32>
    %22 = math.log %21 : vector<16x1xf32>
    %cst_11 = arith.constant 0.000000e+00 : f32
    %23 = vector.broadcast %cst_11 : f32 to vector<16x1xf32>
    %24 = arith.subf %23, %22 : vector<16x1xf32>
    %c0_12 = arith.constant 0 : index
    %c0_13 = arith.constant 0 : index
    %25 = vector.load %arg4[%c0_12, %c0_13] : memref<16x1xf32, #tpu.memory_space<vmem>>, vector<16x1xf32>
    tpu.vector_store %arg4[%c0_12, %c0_13], %24 {strides = array<i32>} : memref<16x1xf32, #tpu.memory_space<vmem>>, vector<16x1xf32>,
    return
  }
  func.func @transform_0(%arg0: i32) -> (i32, i32) {
    %c0_i32 = arith.constant 0 : i32
    %c0_i32_0 = arith.constant 0 : i32
    return %arg0, %c0_i32 : i32, i32
  }
  func.func @transform_1(%arg0: i32) -> (i32, i32) {
    %c0_i32 = arith.constant 0 : i32
    %c0_i32_0 = arith.constant 0 : i32
    return %arg0, %c0_i32 : i32, i32
  }
  func.func @transform_2(%arg0: i32) -> (i32, i32) {
    %c0_i32 = arith.constant 0 : i32
    %c0_i32_0 = arith.constant 0 : i32
    %c0_i32_1 = arith.constant 0 : i32
    return %c0_i32, %c0_i32_0 : i32, i32
  }
  func.func @transform_3(%arg0: i32) -> (i32, i32) {
    %c0_i32 = arith.constant 0 : i32
    %c0_i32_0 = arith.constant 0 : i32
    return %arg0, %c0_i32 : i32, i32
  }
}

</mosaic_0001>

<bundles_post_ra>
// kernel: tpu_custom_call.1
= control target key start
LH: loop header
LB: loop body
LE: loop exit
PB: predicated region body
PF: predicated region fallthrough
CT: control target
= control target key end

     0   :  { %vm104_vm0 = vcmask 130048   ;;  %vm169_vm9 = vcmask 7168   ;;  %s298_s2 = inlined_call_operand.vmem [shape: bf16[128,16], index: 2, kind: input, shape index: {}]   ;;  %s299_s1 = inlined_call_operand.vmem [shape: bf16[16,128], index: 1, kind: input, shape index: {}]   ;;  %s300_s0 = inlined_call_operand.vmem [shape: f32[16,1], index: 0, kind: input, shape index: {}]   ;;  %s301_s3 = inlined_call_operand.vmem [shape: f32[16,1], index: 3, kind: output, shape index: {}]  }
   0x1   :  { %v222_v0 = vld [vmem:[%s298_s2 + $0x38] sm:$0xff]  ;;  %v221_v1 = vld [vmem:[%s298_s2 + $0x30] sm:$0xff]  ;;  %v220_v2 = vld [vmem:[%s298_s2 + $0x28] sm:$0xff] }
   0x2   :  { %86 = vmatpush.bf16.msra.mxu0 %v222_v0  ;;  %v219_v3 = vld [vmem:[%s298_s2 + $0x20] sm:$0xff]  ;;  %v218_v4 = vld [vmem:[%s298_s2 + $0x18] sm:$0xff]  ;;  %v217_v5 = vld [vmem:[%s298_s2 + $0x10] sm:$0xff] }
   0x3   :  { %v216_v6 = vld [vmem:[%s298_s2 + $0x8] sm:$0xff]  ;;  %v215_v7 = vld [vmem:[%s298_s2] sm:$0xff] }
   0x4   :  { %v214_v8 = vld [vmem:[%s299_s1] sm:$0xff]  ;;  %v112_v20 = vld [vmem:[%s300_s0 + $0x8] sm:$0xff] }
   0x5   :  { %v111_v17 = vld [vmem:[%s300_s0] sm:$0xff]  ;;  %v114_v21 = vmul.f32 2.0, %v112_v20 }
   0x6   :  { %87 = vmatpush.bf16.msra.mxu0 %v221_v1  ;;  %v113_v18 = vmul.f32 2.0, %v111_v17 }
   0x7   :  { %v117_v22 = vmul.f32 1.442695, %v114_v21 }
   0x8   :  { %v115_v19 = vmul.f32 1.442695, %v113_v18 }
   0xa   :  { %88 = vmatpush.bf16.msra.mxu0 %v220_v2 }
   0xe   :  { %89 = vmatpush.bf16.msra.mxu0 %v219_v3 }
  0x12   :  { %90 = vmatpush.bf16.msra.mxu0 %v218_v4 }
  0x16   :  { %91 = vmatpush.bf16.msra.mxu0 %v217_v5 }
  0x1a   :  { %92 = vmatpush.bf16.msra.mxu0 %v216_v6 }
  0x1e   :  { %93 = vmatpush.bf16.msra.mxu0 %v215_v7 }
  0x21   :  { %94 = vmatmul.bf16.vlgmr.msra.gmra.mxu0 %v214_v8 }
  0x9e   :  { %v95_v9 = vpop.f32.mrf.mxu0 }
  0x9f   :  { %v100_v10 = vmul.f32 1.442695, %v95_v9 }
  0xa1   :  { %223 = vpow2.f32 %v100_v10 }
  0xa6   :  { %v97_v11 = vpop.f32.mrf.mxu0 }
  0xa7   :  { %v224_v12 = vpop.eup %223  ;;  %v102_v13 = vmul.f32 1.442695, %v97_v11 }
  0xa8   :  { %v105_v14 = vsel %vm104_vm0, %v224_v12, 0.0 }
  0xa9   :  { %225 = vpow2.f32 %v102_v13  ;;  %106 = vadd.xlane.f32.xlu0 %v105_v14 }
  0xaa   :  { %227 = vpow2.f32 %v115_v19 }
  0xab   :  { %229 = vpow2.f32 %v117_v22 }
  0xaf   :  { %v226_v15 = vpop.eup %225 }
  0xb0   :  { %v108_v16 = vsel %vm104_vm0, %v226_v15, 0.0  ;;  %v228_v23 = vpop.eup %227 }
  0xb1   :  { %109 = vadd.xlane.f32.xlu0 %v108_v16  ;;  %v123_v26 = vmul.f32 -1.4, %v228_v23  ;;  %v230_v29 = vpop.eup %229 }
  0xb2   :  { %v124_v34 = vmul.f32 -1.4, %v230_v29 }
 0x11c   :  { %v107_v24 = vpop.xlane.xlu0 %106 }
 0x11d   :  { %v212_v25 = vadd.f32 -7.389056, %v107_v24 }
 0x11f   :  { %v121_v27 = vsub.f32 %v212_v25, %v228_v23 }
 0x121   :  { %v125_v28 = vadd.f32 %v123_v26, %v121_v27 }
 0x123   :  { %v127_v30 = vmul.f32 1.1111112, %v125_v28 }
 0x124   :  { %v110_v31 = vpop.xlane.xlu0 %109 }
 0x125   :  { %v129_v32 = vmax.f32 %v127_v30, 1.894694  ;;  %v213_v33 = vadd.f32 -7.389056, %v110_v31 }
 0x127   :  { %v131_v35 = vadd.f32 %v228_v23, %v129_v32  ;;  %v122_v36 = vsub.f32 %v213_v33, %v230_v29 }
 0x129   :  { %231 = vrcp.f32 %v131_v35  ;;  %v126_v37 = vadd.f32 %v124_v34, %v122_v36  ;;  %v144_v44 = vand.u32 2147483648, %v131_v35  ;;  %v142_v46 = vand.u32 2147483647, %v131_v35 }
 0x12a   :  { %vm138_vm2 = vweird.f32 %v131_v35 }
 0x12b   :  { %v128_v38 = vmul.f32 1.1111112, %v126_v37  ;;  %v145_v48 = vor.u32 1.1754944e-38, %v144_v44  ;;  %vm143_vm4 = vcmp.eq.f32.partialorder %v142_v46, 8.507059e+37 }
 0x12d   :  { %v130_v39 = vmax.f32 %v128_v38, 1.894694 }
 0x12f   :  { %v232_v40 = vpop.eup %231  ;;  %v132_v42 = vadd.f32 %v230_v29, %v130_v39 }
 0x130   :  { %v134_v41 = vmul.f32 %v232_v40, %v131_v35  ;;  %vm139_vm1 = vweird.f32 %v232_v40 }
 0x131   :  { %233 = vrcp.f32 %v132_v42  ;;  %vm140_vm3 = vmor %vm138_vm2, %vm139_vm1  ;;  %v159_v55 = vand.u32 2147483648, %v132_v42  ;;  %v157_v57 = vand.u32 2147483647, %v132_v42  ;;  %vm153_vm6 = vweird.f32 %v132_v42 }
 0x132   :  { %v135_v43 = vsub.f32 1.0, %v134_v41 }
 0x133   :  { %v160_v59 = vor.u32 1.1754944e-38, %v159_v55  ;;  %vm158_vm8 = vcmp.eq.f32.partialorder %v157_v57, 8.507059e+37 }
 0x134   :  { %v136_v45 = vmul.f32 %v232_v40, %v135_v43 }
 0x136   :  { %v137_v47 = vadd.f32 %v232_v40, %v136_v45 }
 0x137   :  { %v234_v49 = vpop.eup %233 }
 0x138   :  { %v141_v50 = vsel %vm140_vm3, %v232_v40, %v137_v47  ;;  %v149_v52 = vmul.f32 %v234_v49, %v132_v42  ;;  %vm154_vm5 = vweird.f32 %v234_v49 }
 0x139   :  { %v146_v51 = vsel %vm143_vm4, %v145_v48, %v141_v50  ;;  %vm155_vm7 = vmor %vm153_vm6, %vm154_vm5 }
 0x13a   :  { %v147_v53 = vmul.f32 %v228_v23, %v146_v51  ;;  %v150_v54 = vsub.f32 1.0, %v149_v52 }
 0x13c   :  { %235 = vlog2.f32 %v147_v53  ;;  %v151_v56 = vmul.f32 %v234_v49, %v150_v54 }
 0x13e   :  { %v152_v58 = vadd.f32 %v234_v49, %v151_v56 }
 0x140   :  { %v156_v60 = vsel %vm155_vm7, %v234_v49, %v152_v58 }
 0x141   :  { %v161_v62 = vsel %vm158_vm8, %v160_v59, %v156_v60 }
 0x142   :  { %v236_v61 = vpop.eup %235  ;;  %v162_v0 = vmul.f32 %v230_v29, %v161_v62 }
 0x143   :  { %v164_v63 = vmul.f32 0.6931472, %v236_v61 }
 0x144   :  { %237 = vlog2.f32 %v162_v0 }
 0x145   :  { %v167_v1 = vsub.f32 0.0, %v164_v63 }
 0x147   :  { %170 = vst.msk [vmem:[%s301_s3] sm:$0xff] %vm169_vm9, %v167_v1 }
 0x14a   :  { %v238_v2 = vpop.eup %237 }
 0x14b   :  { %v166_v3 = vmul.f32 0.6931472, %v238_v2 }
 0x14d   :  { %v168_v4 = vsub.f32 0.0, %v166_v3 }
 0x14f   :  { %171 = vst.msk [vmem:[%s301_s3 + $0x8] sm:$0xff] %vm169_vm9, %v168_v4 }

// kernel: tpu_custom_call.1
= control target key start
LH: loop header
LB: loop body
LE: loop exit
PB: predicated region body
PF: predicated region fallthrough
CT: control target
= control target key end

     0   :  { %vm104_vm0 = vcmask 130048   ;;  %vm169_vm9 = vcmask 7168   ;;  %s298_s2 = inlined_call_operand.vmem [shape: bf16[128,16], index: 2, kind: input, shape index: {}]   ;;  %s299_s1 = inlined_call_operand.vmem [shape: bf16[16,128], index: 1, kind: input, shape index: {}]   ;;  %s300_s0 = inlined_call_operand.vmem [shape: f32[16,1], index: 0, kind: input, shape index: {}]   ;;  %s301_s3 = inlined_call_operand.vmem [shape: f32[16,1], index: 3, kind: output, shape index: {}]  }
   0x1   :  { %v222_v0 = vld [vmem:[%s298_s2 + $0x38] sm:$0xff]  ;;  %v221_v1 = vld [vmem:[%s298_s2 + $0x30] sm:$0xff]  ;;  %v220_v2 = vld [vmem:[%s298_s2 + $0x28] sm:$0xff] }
   0x2   :  { %86 = vmatpush.bf16.msra.mxu0 %v222_v0  ;;  %v219_v3 = vld [vmem:[%s298_s2 + $0x20] sm:$0xff]  ;;  %v218_v4 = vld [vmem:[%s298_s2 + $0x18] sm:$0xff]  ;;  %v217_v5 = vld [vmem:[%s298_s2 + $0x10] sm:$0xff] }
   0x3   :  { %v216_v6 = vld [vmem:[%s298_s2 + $0x8] sm:$0xff]  ;;  %v215_v7 = vld [vmem:[%s298_s2] sm:$0xff] }
   0x4   :  { %v214_v8 = vld [vmem:[%s299_s1] sm:$0xff]  ;;  %v112_v20 = vld [vmem:[%s300_s0 + $0x8] sm:$0xff] }
   0x5   :  { %v111_v17 = vld [vmem:[%s300_s0] sm:$0xff]  ;;  %v114_v21 = vmul.f32 2.0, %v112_v20 }
   0x6   :  { %87 = vmatpush.bf16.msra.mxu0 %v221_v1  ;;  %v113_v18 = vmul.f32 2.0, %v111_v17 }
   0x7   :  { %v117_v22 = vmul.f32 1.442695, %v114_v21 }
   0x8   :  { %v115_v19 = vmul.f32 1.442695, %v113_v18 }
   0xa   :  { %88 = vmatpush.bf16.msra.mxu0 %v220_v2 }
   0xe   :  { %89 = vmatpush.bf16.msra.mxu0 %v219_v3 }
  0x12   :  { %90 = vmatpush.bf16.msra.mxu0 %v218_v4 }
  0x16   :  { %91 = vmatpush.bf16.msra.mxu0 %v217_v5 }
  0x1a   :  { %92 = vmatpush.bf16.msra.mxu0 %v216_v6 }
  0x1e   :  { %93 = vmatpush.bf16.msra.mxu0 %v215_v7 }
  0x21   :  { %94 = vmatmul.bf16.vlgmr.msra.gmra.mxu0 %v214_v8 }
  0x9e   :  { %v95_v9 = vpop.f32.mrf.mxu0 }
  0x9f   :  { %v100_v10 = vmul.f32 1.442695, %v95_v9 }
  0xa1   :  { %223 = vpow2.f32 %v100_v10 }
  0xa6   :  { %v97_v11 = vpop.f32.mrf.mxu0 }
  0xa7   :  { %v224_v12 = vpop.eup %223  ;;  %v102_v13 = vmul.f32 1.442695, %v97_v11 }
  0xa8   :  { %v105_v14 = vsel %vm104_vm0, %v224_v12, 0.0 }
  0xa9   :  { %225 = vpow2.f32 %v102_v13  ;;  %106 = vadd.xlane.f32.xlu0 %v105_v14 }
  0xaa   :  { %227 = vpow2.f32 %v115_v19 }
  0xab   :  { %229 = vpow2.f32 %v117_v22 }
  0xaf   :  { %v226_v15 = vpop.eup %225 }
  0xb0   :  { %v108_v16 = vsel %vm104_vm0, %v226_v15, 0.0  ;;  %v228_v23 = vpop.eup %227 }
  0xb1   :  { %109 = vadd.xlane.f32.xlu0 %v108_v16  ;;  %v123_v26 = vmul.f32 -1.4, %v228_v23  ;;  %v230_v29 = vpop.eup %229 }
  0xb2   :  { %v124_v34 = vmul.f32 -1.4, %v230_v29 }
 0x11c   :  { %v107_v24 = vpop.xlane.xlu0 %106 }
 0x11d   :  { %v212_v25 = vadd.f32 -7.389056, %v107_v24 }
 0x11f   :  { %v121_v27 = vsub.f32 %v212_v25, %v228_v23 }
 0x121   :  { %v125_v28 = vadd.f32 %v123_v26, %v121_v27 }
 0x123   :  { %v127_v30 = vmul.f32 1.1111112, %v125_v28 }
 0x124   :  { %v110_v31 = vpop.xlane.xlu0 %109 }
 0x125   :  { %v129_v32 = vmax.f32 %v127_v30, 1.894694  ;;  %v213_v33 = vadd.f32 -7.389056, %v110_v31 }
 0x127   :  { %v131_v35 = vadd.f32 %v228_v23, %v129_v32  ;;  %v122_v36 = vsub.f32 %v213_v33, %v230_v29 }
 0x129   :  { %231 = vrcp.f32 %v131_v35  ;;  %v126_v37 = vadd.f32 %v124_v34, %v122_v36  ;;  %v144_v44 = vand.u32 2147483648, %v131_v35  ;;  %v142_v46 = vand.u32 2147483647, %v131_v35 }
 0x12a   :  { %vm138_vm2 = vweird.f32 %v131_v35 }
 0x12b   :  { %v128_v38 = vmul.f32 1.1111112, %v126_v37  ;;  %v145_v48 = vor.u32 1.1754944e-38, %v144_v44  ;;  %vm143_vm4 = vcmp.eq.f32.partialorder %v142_v46, 8.507059e+37 }
 0x12d   :  { %v130_v39 = vmax.f32 %v128_v38, 1.894694 }
 0x12f   :  { %v232_v40 = vpop.eup %231  ;;  %v132_v42 = vadd.f32 %v230_v29, %v130_v39 }
 0x130   :  { %v134_v41 = vmul.f32 %v232_v40, %v131_v35  ;;  %vm139_vm1 = vweird.f32 %v232_v40 }
 0x131   :  { %233 = vrcp.f32 %v132_v42  ;;  %vm140_vm3 = vmor %vm138_vm2, %vm139_vm1  ;;  %v159_v55 = vand.u32 2147483648, %v132_v42  ;;  %v157_v57 = vand.u32 2147483647, %v132_v42  ;;  %vm153_vm6 = vweird.f32 %v132_v42 }
 0x132   :  { %v135_v43 = vsub.f32 1.0, %v134_v41 }
 0x133   :  { %v160_v59 = vor.u32 1.1754944e-38, %v159_v55  ;;  %vm158_vm8 = vcmp.eq.f32.partialorder %v157_v57, 8.507059e+37 }
 0x134   :  { %v136_v45 = vmul.f32 %v232_v40, %v135_v43 }
 0x136   :  { %v137_v47 = vadd.f32 %v232_v40, %v136_v45 }
 0x137   :  { %v234_v49 = vpop.eup %233 }
 0x138   :  { %v141_v50 = vsel %vm140_vm3, %v232_v40, %v137_v47  ;;  %v149_v52 = vmul.f32 %v234_v49, %v132_v42  ;;  %vm154_vm5 = vweird.f32 %v234_v49 }
 0x139   :  { %v146_v51 = vsel %vm143_vm4, %v145_v48, %v141_v50  ;;  %vm155_vm7 = vmor %vm153_vm6, %vm154_vm5 }
 0x13a   :  { %v147_v53 = vmul.f32 %v228_v23, %v146_v51  ;;  %v150_v54 = vsub.f32 1.0, %v149_v52 }
 0x13c   :  { %235 = vlog2.f32 %v147_v53  ;;  %v151_v56 = vmul.f32 %v234_v49, %v150_v54 }
 0x13e   :  { %v152_v58 = vadd.f32 %v234_v49, %v151_v56 }
 0x140   :  { %v156_v60 = vsel %vm155_vm7, %v234_v49, %v152_v58 }
 0x141   :  { %v161_v62 = vsel %vm158_vm8, %v160_v59, %v156_v60 }
 0x142   :  { %v236_v61 = vpop.eup %235  ;;  %v162_v0 = vmul.f32 %v230_v29, %v161_v62 }
 0x143   :  { %v164_v63 = vmul.f32 0.6931472, %v236_v61 }
 0x144   :  { %237 = vlog2.f32 %v162_v0 }
 0x145   :  { %v167_v1 = vsub.f32 0.0, %v164_v63 }
 0x147   :  { %170 = vst.msk [vmem:[%s301_s3] sm:$0xff] %vm169_vm9, %v167_v1 }
 0x14a   :  { %v238_v2 = vpop.eup %237 }
 0x14b   :  { %v166_v3 = vmul.f32 0.6931472, %v238_v2 }
 0x14d   :  { %v168_v4 = vsub.f32 0.0, %v166_v3 }
 0x14f   :  { %171 = vst.msk [vmem:[%s301_s3 + $0x8] sm:$0xff] %vm169_vm9, %v168_v4 }

</bundles_post_ra>
